<compile_context>
chip_gen: v7x
topology: tpu7x:2x2x1
jax: 0.10.0
libtpu: 0.0.40
codegen_flags: <defaults>
</compile_context>

<pallas_src>
import math
import functools

import jax
import jax.numpy as jnp
from jax.experimental import pallas as pl
from jax.experimental.pallas import tpu as pltpu


def _bernnet_kernel(w_ref, x_ref, w1_ref, b1_ref, w2_ref, b2_ref, lap_ref,
                    o_ref, *, K, C, C_pad):
    """Single-invocation kernel: MLP -> fused Bernstein/Horner propagation -> log_softmax."""
    # Hoist the K+1 Horner scalars (SMEM sld + lane broadcast) off the MXU
    # critical path; scalar/VPU slots are idle during the matmul drain.
    ws = [w_ref[j] for j in range(K + 1)]

    # --- x = relu(lin1(x)) ; dropout is identity in eval mode ---
    x = x_ref[...]                                   # bf16 [N, F]
    h = jnp.dot(x, w1_ref[...], preferred_element_type=jnp.float32) + b1_ref[...]
    h = jnp.maximum(h, 0.0)                          # f32 [N, H]

    # --- z = lin2(h)  (class dim zero-padded to a lane-dense 128) ---
    z = (jnp.dot(h.astype(jnp.bfloat16), w2_ref[...],
                 preferred_element_type=jnp.float32) + b2_ref[...])  # f32 [N, C_pad]

    L = lap_ref[...]                                 # bf16 [N, N]

    # --- Bern_prop, fused tmp/Horner loop ---
    #   tmp_i = (2I - L)^i z          (tmp_0 = z)
    #   out_i = L @ out_{i-1} + w[K-i] * tmp_i   (out_0 = w[K] * z)
    # => out_K = sum_j C(K,j)/2^K * relu(temp[j]) * L^j (2I-L)^{K-j} z
    # One matmul per step: LV = L @ [tmp | out] fills 2*C_pad = 256 lanes.
    tmp = z
    out = ws[K] * z
    for i in range(1, K + 1):
        rhs = jnp.concatenate([tmp, out], axis=-1).astype(jnp.bfloat16)  # [N, 2*C_pad]
        LV = jnp.dot(L, rhs, preferred_element_type=jnp.float32)
        Lt = LV[:, :C_pad]
        Lo = LV[:, C_pad:]
        tmp = 2.0 * tmp - Lt                          # M @ tmp  (VPU axpy)
        out = Lo + ws[K - i] * tmp

    # --- log_softmax over the real C class lanes (pad lanes masked out) ---
    lane = jax.lax.broadcasted_iota(jnp.int32, out.shape, dimension=1)
    valid = lane < C
    masked = jnp.where(valid, out, -jnp.inf)
    mx = jnp.max(masked, axis=1, keepdims=True)
    s = out - mx
    e = jnp.where(valid, jnp.exp(s), 0.0)
    lse = jnp.log(jnp.sum(e, axis=1, keepdims=True))
    o_ref[...] = (s - lse).astype(o_ref.dtype)


def prepare_bernnet(edge_index, N, w1, b1, w2, b2, temp, K):
    """One-time per-graph / per-checkpoint preprocessing (hoisted off the hot path).

    Returns (w, w1_bf16, b1_f32[1,H], w2_pad_bf16, b2_pad_f32[1,C_pad], L_bf16, C, C_pad).
    """
    C = w2.shape[1]
    H = w1.shape[1]
    C_pad = ((C + 127) // 128) * 128

    # Dense adjacency (message flows src -> dst, aggregated at dst).
    src, dst = edge_index[0], edge_index[1]
    A = jnp.zeros((N, N), jnp.float32).at[dst, src].add(1.0)
    deg = jnp.sum(A, axis=1)
    dinv = jnp.where(deg > 0, 1.0 / jnp.sqrt(jnp.maximum(deg, 1e-12)), 0.0)
    A_norm = dinv[:, None] * A * dinv[None, :]
    L = jnp.eye(N, dtype=jnp.float32) - A_norm       # get_laplacian(..., 'sym')

    # Fused per-term scalar: w[k] = C(K,k)/2^K * relu(temp[k])   (SMEM vector)
    coef = jnp.array([math.comb(K, k) / (2.0 ** K) for k in range(K + 1)],
                     dtype=jnp.float32)
    w = coef * jnp.maximum(temp, 0.0)

    # Zero-pad lin2 columns so z / out / the output store are lane-dense
    # (pad lanes of z stay exactly zero; log_softmax masks them anyway).
    w2_p = jnp.zeros((H, C_pad), jnp.float32).at[:, :C].set(w2)
    b2_p = jnp.zeros((1, C_pad), jnp.float32).at[0, :C].set(b2)

    return (w,
            w1.astype(jnp.bfloat16), b1.reshape(1, -1).astype(jnp.float32),
            w2_p.astype(jnp.bfloat16), b2_p,
            L.astype(jnp.bfloat16), C, C_pad)


@functools.partial(jax.jit, static_argnames=("K", "C", "C_pad"))
def bernnet_forward(x, w, w1_b, b1_f, w2_b, b2_f, L_b, *, K, C, C_pad):
    """Jitted hot path: cast x and run the fused Pallas kernel."""
    N, F_in = x.shape
    H = w1_b.shape[1]

    kernel = functools.partial(_bernnet_kernel, K=K, C=C, C_pad=C_pad)
    smem = pl.BlockSpec(memory_space=pltpu.MemorySpace.SMEM)
    vmem = pl.BlockSpec(memory_space=pltpu.MemorySpace.VMEM)

    flops = (2 * N * F_in * H                        # lin1
             + 2 * N * H * C_pad                     # lin2
             + K * 2 * N * N * (2 * C_pad))          # K fused propagation matmuls
    bytes_accessed = (2 * (N * F_in + F_in * H + H * C_pad + N * N)   # bf16 operands
                      + 4 * (H + C_pad + N * C_pad + (K + 1)))        # f32 bias/out/w

    out_p = pl.pallas_call(
        kernel,
        out_shape=jax.ShapeDtypeStruct((N, C_pad), jnp.float32),
        in_specs=[smem, vmem, vmem, vmem, vmem, vmem, vmem],
        out_specs=vmem,
        cost_estimate=pl.CostEstimate(flops=flops,
                                      transcendentals=N * C_pad,
                                      bytes_accessed=bytes_accessed),
    )(w, x.astype(jnp.bfloat16), w1_b, b1_f, w2_b, b2_f, L_b)

    return out_p[:, :C]


def _reference(x, edge_index, w1, b1, w2, b2, temp, K):
    """Pure-JAX f32 reference of the original (non-Horner) forward, as a guard."""
    N = x.shape[0]
    src, dst = edge_index[0], edge_index[1]
    A = jnp.zeros((N, N), jnp.float32).at[dst, src].add(1.0)
    deg = jnp.sum(A, axis=1)
    dinv = jnp.where(deg > 0, 1.0 / jnp.sqrt(jnp.maximum(deg, 1e-12)), 0.0)
    A_norm = dinv[:, None] * A * dinv[None, :]
    eye = jnp.eye(N, dtype=jnp.float32)
    L = eye - A_norm
    M = 2.0 * eye - L

    h = jnp.maximum(x @ w1 + b1, 0.0)
    z = h @ w2 + b2
    TEMP = jnp.maximum(temp, 0.0)

    tmp = [z]
    for _ in range(K):
        tmp.append(M @ tmp[-1])
    out = (math.comb(K, 0) / 2 ** K) * TEMP[0] * tmp[K]
    for i in range(K):
        v = tmp[K - i - 1]
        for _ in range(i + 1):
            v = L @ v
        out = out + (math.comb(K, i + 1) / 2 ** K) * TEMP[i + 1] * v
    return jax.nn.log_softmax(out, axis=1)


if __name__ == "__main__":
    # Small synthetic problem consistent with the module:
    #   N nodes, num_features -> hidden -> num_classes, Bernstein order K.
    N, F_IN, HIDDEN, C, K = 32, 16, 32, 8, 4

    key = jax.random.PRNGKey(0)
    k_x, k_w1, k_b1, k_w2, k_b2 = jax.random.split(key, 5)

    x = jax.random.normal(k_x, (N, F_IN), dtype=jnp.float32)

    # Deterministic "Linear" parameters (PyTorch-style uniform fan-in init).
    lim1 = 1.0 / math.sqrt(F_IN)
    w1 = jax.random.uniform(k_w1, (F_IN, HIDDEN), jnp.float32, -lim1, lim1)
    b1 = jax.random.uniform(k_b1, (HIDDEN,), jnp.float32, -lim1, lim1)
    lim2 = 1.0 / math.sqrt(HIDDEN)
    w2 = jax.random.uniform(k_w2, (HIDDEN, C), jnp.float32, -lim2, lim2)
    b2 = jax.random.uniform(k_b2, (C,), jnp.float32, -lim2, lim2)

    # Bern_prop.reset_parameters(): temp filled with 1.0.
    temp = jnp.ones((K + 1,), dtype=jnp.float32)

    # Deterministic undirected graph: ring over N nodes (both directions).
    idx = jnp.arange(N, dtype=jnp.int32)
    nxt = (idx + 1) % N
    edge_index = jnp.stack(
        [jnp.concatenate([idx, nxt]), jnp.concatenate([nxt, idx])], axis=0
    )

    # One-time graph/weight preprocessing (hoisted off the per-forward path).
    (w, w1_b, b1_f, w2_b, b2_f, L_b, C_out, C_pad) = prepare_bernnet(
        edge_index, N, w1, b1, w2, b2, temp, K)

    out = bernnet_forward(x, w, w1_b, b1_f, w2_b, b2_f, L_b,
                          K=K, C=C_out, C_pad=C_pad)
    out = jax.block_until_ready(out)

    ref = _reference(x, edge_index, w1, b1, w2, b2, temp, K)
    assert out.shape == (N, C)
    # bf16 MXU operands (f32 accumulation) => tolerance appropriate for bf16
    # inputs; the algebra (Horner + 2*v - L@v) is exact.
    assert jnp.allclose(out, ref, atol=3e-2, rtol=3e-2), float(
        jnp.max(jnp.abs(out - ref)))

    print("KERNEL_OK")
</pallas_src>

<mosaic_0001>
module attributes {stable_mosaic.version = 11 : i64} {
  func.func @_bernnet_kernel(%arg0: memref<5xf32, #tpu.memory_space<smem>>, %arg1: memref<32x16xbf16, #tpu.memory_space<vmem>>, %arg2: memref<16x32xbf16, #tpu.memory_space<vmem>>, %arg3: memref<1x32xf32, #tpu.memory_space<vmem>>, %arg4: memref<32x128xbf16, #tpu.memory_space<vmem>>, %arg5: memref<1x128xf32, #tpu.memory_space<vmem>>, %arg6: memref<32x32xbf16, #tpu.memory_space<vmem>>, %arg7: memref<32x128xf32, #tpu.memory_space<vmem>>) attributes {dimension_semantics = [], scalar_prefetch = 0 : i64, scratch_operands = 0 : i64, tpu.core_type = #tpu.core_type<tc>} {
    %c0 = arith.constant 0 : index
    %0 = memref.load %arg0[%c0] : memref<5xf32, #tpu.memory_space<smem>>
    %c1 = arith.constant 1 : index
    %1 = memref.load %arg0[%c1] : memref<5xf32, #tpu.memory_space<smem>>
    %c2 = arith.constant 2 : index
    %2 = memref.load %arg0[%c2] : memref<5xf32, #tpu.memory_space<smem>>
    %c3 = arith.constant 3 : index
    %3 = memref.load %arg0[%c3] : memref<5xf32, #tpu.memory_space<smem>>
    %c4 = arith.constant 4 : index
    %4 = memref.load %arg0[%c4] : memref<5xf32, #tpu.memory_space<smem>>
    %c0_0 = arith.constant 0 : index
    %c0_1 = arith.constant 0 : index
    %5 = vector.load %arg1[%c0_0, %c0_1] : memref<32x16xbf16, #tpu.memory_space<vmem>>, vector<32x16xbf16>
    %c0_2 = arith.constant 0 : index
    %c0_3 = arith.constant 0 : index
    %6 = vector.load %arg2[%c0_2, %c0_3] : memref<16x32xbf16, #tpu.memory_space<vmem>>, vector<16x32xbf16>
    %cst = arith.constant dense<0.000000e+00> : vector<32x32xf32>
    %7 = tpu.matmul %5, %6, %cst {dimension_numbers = #tpu.dot_dimension_numbers<[1], [0], [0], [1], [0, 0, 1, 1], [], []>} : vector<32x16xbf16>, vector<16x32xbf16>, vector<32x32xf32> -> vector<32x32xf32>
    %c0_4 = arith.constant 0 : index
    %c0_5 = arith.constant 0 : index
    %8 = vector.load %arg3[%c0_4, %c0_5] : memref<1x32xf32, #tpu.memory_space<vmem>>, vector<1x32xf32>
    %9 = vector.broadcast %8 : vector<1x32xf32> to vector<32x32xf32>
    %10 = arith.addf %7, %9 : vector<32x32xf32>
    %cst_6 = arith.constant 0.000000e+00 : f32
    %11 = vector.broadcast %cst_6 : f32 to vector<32x32xf32>
    %12 = arith.maximumf %10, %11 : vector<32x32xf32>
    %13 = arith.truncf %12 : vector<32x32xf32> to vector<32x32xbf16>
    %c0_7 = arith.constant 0 : index
    %c0_8 = arith.constant 0 : index
    %14 = vector.load %arg4[%c0_7, %c0_8] : memref<32x128xbf16, #tpu.memory_space<vmem>>, vector<32x128xbf16>
    %cst_9 = arith.constant dense<0.000000e+00> : vector<32x128xf32>
    %15 = tpu.matmul %13, %14, %cst_9 {dimension_numbers = #tpu.dot_dimension_numbers<[1], [0], [0], [1], [0, 0, 1, 1], [], []>} : vector<32x32xbf16>, vector<32x128xbf16>, vector<32x128xf32> -> vector<32x128xf32>
    %c0_10 = arith.constant 0 : index
    %c0_11 = arith.constant 0 : index
    %16 = vector.load %arg5[%c0_10, %c0_11] : memref<1x128xf32, #tpu.memory_space<vmem>>, vector<1x128xf32>
    %17 = vector.broadcast %16 : vector<1x128xf32> to vector<32x128xf32>
    %18 = arith.addf %15, %17 : vector<32x128xf32>
    %c0_12 = arith.constant 0 : index
    %c0_13 = arith.constant 0 : index
    %19 = vector.load %arg6[%c0_12, %c0_13] : memref<32x32xbf16, #tpu.memory_space<vmem>>, vector<32x32xbf16>
    %20 = vector.broadcast %4 : f32 to vector<32x128xf32>
    %21 = arith.mulf %20, %18 : vector<32x128xf32>
    %22 = tpu.concatenate %18, %21 in 1 : vector<32x128xf32>, vector<32x128xf32> -> vector<32x256xf32>
    %23 = arith.truncf %22 : vector<32x256xf32> to vector<32x256xbf16>
    %cst_14 = arith.constant dense<0.000000e+00> : vector<32x256xf32>
    %24 = tpu.matmul %19, %23, %cst_14 {dimension_numbers = #tpu.dot_dimension_numbers<[1], [0], [0], [1], [0, 0, 1, 1], [], []>} : vector<32x32xbf16>, vector<32x256xbf16>, vector<32x256xf32> -> vector<32x256xf32>
    %25 = vector.extract_strided_slice %24 {offsets = [0, 0], sizes = [32, 128], strides = [1, 1]} : vector<32x256xf32> to vector<32x128xf32>
    %26 = vector.extract_strided_slice %24 {offsets = [0, 128], sizes = [32, 128], strides = [1, 1]} : vector<32x256xf32> to vector<32x128xf32>
    %cst_15 = arith.constant 2.000000e+00 : f32
    %27 = vector.broadcast %cst_15 : f32 to vector<32x128xf32>
    %28 = arith.mulf %27, %18 : vector<32x128xf32>
    %29 = arith.subf %28, %25 : vector<32x128xf32>
    %30 = vector.broadcast %3 : f32 to vector<32x128xf32>
    %31 = arith.mulf %30, %29 : vector<32x128xf32>
    %32 = arith.addf %26, %31 : vector<32x128xf32>
    %33 = tpu.concatenate %29, %32 in 1 : vector<32x128xf32>, vector<32x128xf32> -> vector<32x256xf32>
    %34 = arith.truncf %33 : vector<32x256xf32> to vector<32x256xbf16>
    %cst_16 = arith.constant dense<0.000000e+00> : vector<32x256xf32>
    %35 = tpu.matmul %19, %34, %cst_16 {dimension_numbers = #tpu.dot_dimension_numbers<[1], [0], [0], [1], [0, 0, 1, 1], [], []>} : vector<32x32xbf16>, vector<32x256xbf16>, vector<32x256xf32> -> vector<32x256xf32>
    %36 = vector.extract_strided_slice %35 {offsets = [0, 0], sizes = [32, 128], strides = [1, 1]} : vector<32x256xf32> to vector<32x128xf32>
    %37 = vector.extract_strided_slice %35 {offsets = [0, 128], sizes = [32, 128], strides = [1, 1]} : vector<32x256xf32> to vector<32x128xf32>
    %cst_17 = arith.constant 2.000000e+00 : f32
    %38 = vector.broadcast %cst_17 : f32 to vector<32x128xf32>
    %39 = arith.mulf %38, %29 : vector<32x128xf32>
    %40 = arith.subf %39, %36 : vector<32x128xf32>
    %41 = vector.broadcast %2 : f32 to vector<32x128xf32>
    %42 = arith.mulf %41, %40 : vector<32x128xf32>
    %43 = arith.addf %37, %42 : vector<32x128xf32>
    %44 = tpu.concatenate %40, %43 in 1 : vector<32x128xf32>, vector<32x128xf32> -> vector<32x256xf32>
    %45 = arith.truncf %44 : vector<32x256xf32> to vector<32x256xbf16>
    %cst_18 = arith.constant dense<0.000000e+00> : vector<32x256xf32>
    %46 = tpu.matmul %19, %45, %cst_18 {dimension_numbers = #tpu.dot_dimension_numbers<[1], [0], [0], [1], [0, 0, 1, 1], [], []>} : vector<32x32xbf16>, vector<32x256xbf16>, vector<32x256xf32> -> vector<32x256xf32>
    %47 = vector.extract_strided_slice %46 {offsets = [0, 0], sizes = [32, 128], strides = [1, 1]} : vector<32x256xf32> to vector<32x128xf32>
    %48 = vector.extract_strided_slice %46 {offsets = [0, 128], sizes = [32, 128], strides = [1, 1]} : vector<32x256xf32> to vector<32x128xf32>
    %cst_19 = arith.constant 2.000000e+00 : f32
    %49 = vector.broadcast %cst_19 : f32 to vector<32x128xf32>
    %50 = arith.mulf %49, %40 : vector<32x128xf32>
    %51 = arith.subf %50, %47 : vector<32x128xf32>
    %52 = vector.broadcast %1 : f32 to vector<32x128xf32>
    %53 = arith.mulf %52, %51 : vector<32x128xf32>
    %54 = arith.addf %48, %53 : vector<32x128xf32>
    %55 = tpu.concatenate %51, %54 in 1 : vector<32x128xf32>, vector<32x128xf32> -> vector<32x256xf32>
    %56 = arith.truncf %55 : vector<32x256xf32> to vector<32x256xbf16>
    %cst_20 = arith.constant dense<0.000000e+00> : vector<32x256xf32>
    %57 = tpu.matmul %19, %56, %cst_20 {dimension_numbers = #tpu.dot_dimension_numbers<[1], [0], [0], [1], [0, 0, 1, 1], [], []>} : vector<32x32xbf16>, vector<32x256xbf16>, vector<32x256xf32> -> vector<32x256xf32>
    %58 = vector.extract_strided_slice %57 {offsets = [0, 0], sizes = [32, 128], strides = [1, 1]} : vector<32x256xf32> to vector<32x128xf32>
    %59 = vector.extract_strided_slice %57 {offsets = [0, 128], sizes = [32, 128], strides = [1, 1]} : vector<32x256xf32> to vector<32x128xf32>
    %cst_21 = arith.constant 2.000000e+00 : f32
    %60 = vector.broadcast %cst_21 : f32 to vector<32x128xf32>
    %61 = arith.mulf %60, %51 : vector<32x128xf32>
    %62 = arith.subf %61, %58 : vector<32x128xf32>
    %63 = vector.broadcast %0 : f32 to vector<32x128xf32>
    %64 = arith.mulf %63, %62 : vector<32x128xf32>
    %65 = arith.addf %59, %64 : vector<32x128xf32>
    %66 = tpu.iota {dimensions = array<i32: 1>} : vector<32x128xi32>
    %c8_i32 = arith.constant 8 : i32
    %67 = vector.broadcast %c8_i32 : i32 to vector<32x128xi32>
    %68 = arith.cmpi slt, %66, %67 : vector<32x128xi32>
    %cst_22 = arith.constant 0xFF800000 : f32
    %69 = vector.broadcast %cst_22 : f32 to vector<32x128xf32>
    %70 = arith.select %68, %65, %69 : vector<32x128xi1>, vector<32x128xf32>
    %cst_23 = arith.constant dense<0xFF800000> : vector<32xf32>
    %71 = vector.multi_reduction <maximumf>, %70, %cst_23 [1] : vector<32x128xf32> to vector<32xf32>
    %72 = vector.shape_cast %71 : vector<32xf32> to vector<32x1xf32>
    %73 = vector.broadcast %72 : vector<32x1xf32> to vector<32x128xf32>
    %74 = arith.subf %65, %73 : vector<32x128xf32>
    %75 = math.exp %74 : vector<32x128xf32>
    %cst_24 = arith.constant 0.000000e+00 : f32
    %76 = vector.broadcast %cst_24 : f32 to vector<32x128xf32>
    %77 = arith.select %68, %75, %76 : vector<32x128xi1>, vector<32x128xf32>
    %cst_25 = arith.constant dense<0.000000e+00> : vector<32xf32>
    %78 = vector.multi_reduction <add>, %77, %cst_25 [1] : vector<32x128xf32> to vector<32xf32>
    %79 = vector.shape_cast %78 : vector<32xf32> to vector<32x1xf32>
    %80 = math.log %79 : vector<32x1xf32>
    %81 = vector.broadcast %80 : vector<32x1xf32> to vector<32x128xf32>
    %82 = arith.subf %74, %81 : vector<32x128xf32>
    %c0_26 = arith.constant 0 : index
    %c0_27 = arith.constant 0 : index
    %83 = vector.load %arg7[%c0_26, %c0_27] : memref<32x128xf32, #tpu.memory_space<vmem>>, vector<32x128xf32>
    tpu.vector_store %arg7[%c0_26, %c0_27], %82 {strides = array<i32>} : memref<32x128xf32, #tpu.memory_space<vmem>>, vector<32x128xf32>,
    return
  }
}

</mosaic_0001>

<bundles_post_ra>
// kernel: bernnet_forward.1
= control target key start
LH: loop header
LB: loop body
LE: loop exit
PB: predicated region body
PF: predicated region fallthrough
CT: control target
= control target key end

     0   :  { %12 = vsyncpa [#allocation3], 0  ;;  %s803_s0 = inlined_call_operand.vmem [shape: f32[5], index: 0, kind: input, shape index: {}]   ;;  %s804_s1 = inlined_call_operand.vmem [shape: bf16[32,16], index: 1, kind: input, shape index: {}]   ;;  %s805_s2 = inlined_call_operand.vmem [shape: bf16[16,32], index: 2, kind: input, shape index: {}]   ;;  %s806_s3 = inlined_call_operand.vmem [shape: f32[1,32], index: 3, kind: input, shape index: {}]   ;;  %s807_s4 = inlined_call_operand.vmem [shape: bf16[32,128], index: 4, kind: input, shape index: {}]   ;;  %s808_s5 = inlined_call_operand.vmem [shape: f32[1,128], index: 5, kind: input, shape index: {}]   ;;  %s809_s6 = inlined_call_operand.vmem [shape: bf16[32,32], index: 6, kind: input, shape index: {}]   ;;  %s810_s7 = inlined_call_operand.vmem [shape: f32[32,128], index: 7, kind: output, shape index: {}]  }
   0x1   :  { %s19_s26 = sshll.u32 %s803_s0, 4  ;;  %s20_s26 = int_to_ptr.vmem [resolvable:$true] %s19_s26 }
   0x2   :  { %s667_s27 = scalar_lea.vmem %s20_s26, 16  ;;  %p672_p1 = scmp.lt.s32.totalorder %s20_s26, %s20_s26 }
   0x3   :  { %p668_p0 = scmp.ne.s32.totalorder %s20_s26, %s667_s27  ;;  %p673_p2 = scmp.lt.s32.totalorder %s667_s27, %s667_s27 }
   0x5   :  { %p674_p3 = por %p673_p2, %p672_p1 }
   0x7   :  { %p675_p4 = pnand %p674_p3, %p668_p0 }
   0x9   :  { %678 = shalt.err (!%p675_p4)
}
   0xa   :  { %s681_s28 = smov [#allocation2]  }
   0xb   :  { %22 = dma.vmem_to_smem %s20_s26, 16, %s681_s28, [#allocation3]  }
   0xc   :  { %679 = dma.done.wait [#allocation3], 16  }
   0xd   :  { %680 = vsyncadd [#allocation3], 4294967280 }
   0xe   :  { %38 = sfence }
   0xf   :  { %v644_v0 = vld [vmem:[%s805_s2] sm:$0xff]   ;;  %vm74_vm0 = vcmask 130048   ;;  %v646_v2 = vld [vmem:[%s804_s1 + $0x8] sm:$0xff]   ;;  %vm159_vm1 = vcmask 261120   ;;  %v682_v20 = vmov 0   ;;  %s598_s19 = sld [smem:[#allocation2 + $0x3]] }
  0x10   :  { %v645_v1 = vld [vmem:[%s804_s1] sm:$0xff]   ;;  %628 = vmatprep.subr.bf16.mxu0 %v644_v0  ;;  %v648_v4 = vld [vmem:[%s807_s4 + $0x8] sm:$0xff]   ;;  %s599_s1 = sld [smem:[#allocation2 + $0x4]]  ;;  %s596_s20 = sld [smem:[#allocation2 + $0x1]] }
  0x11   :  { %629 = vmatpush3.bf16.msra.mxu0 %v644_v0  ;;  %630 = vmatprep.mubr.msk.bf16.mxu0 %vm74_vm0, %v645_v1  ;;  %v647_v3 = vld [vmem:[%s807_s4] sm:$0xff]   ;;  %v762_v40 = vld [vmem:[%s809_s6 + $0x8] sm:$0xff]   ;;  %s40_s21 = sld [smem:[#allocation2]] }
  0x12   :  { %634 = vmatprep.subr.bf16.mxu1 %v647_v3  ;;  %v600_v5 = vld [vmem:[%s806_s3] ss:$0 sm:$0xff] }
  0x13   :  { %635 = vmatpush3.bf16.msra.mxu1 %v647_v3  ;;  %v606_v21 = vld [vmem:[%s808_s5] ss:$0 sm:$0xff] }
  0x14   :  { %631 = vmatmul.mubr.msk.bf16.vlgmr.msra.gmra.mrb[0].mxu0 %vm74_vm0, %v646_v2  ;;  %636 = vmatprep.subr.bf16.mxu1 %v648_v4  ;;  %v754_v39 = vld [vmem:[%s809_s6] sm:$0xff]   ;;  %s597_s6 = sld [smem:[#allocation2 + $0x2]] }
  0x15   :  { %276 = vmatprep.mubr.bf16.mxu0 %v682_v20  ;;  %v305_v43 = vstv %s598_s19 }
  0x16   :  { %v219_v25 = vstv %s599_s1 }
  0x17   :  { %637 = vmatpush3.bf16.msra.mxu1 %v648_v4 }
  0xe7   :  { %v632_v6 = vpop.f32.mrb[0].mxu0 }
  0xe8   :  { %v124_v7 = vadd.f32 %v632_v6, %v600_v5  ;;  %v115_v8 = vpop.f32.mrb[1].mxu0 }
  0xe9   :  { %v116_v9 = vadd.f32 %v600_v5, %v115_v8  ;;  %v633_v10 = vpop.f32.mrb[2].mxu0  ;;  %v379_v8 = vstv %s597_s6 }
  0xea   :  { %v127_v11 = vadd.f32 %v633_v10, %v600_v5  ;;  %v118_v12 = vpop.f32.mrb[3].mxu0  ;;  %v132_v14 = vmax.f32 %v124_v7, 0.0 }
  0xeb   :  { %v119_v13 = vadd.f32 %v600_v5, %v118_v12  ;;  %v130_v16 = vmax.f32 %v116_v9, 0.0 }
  0xec   :  { %v133_v15 = vmax.f32 %v127_v11, 0.0 }
  0xed   :  { %v131_v17 = vmax.f32 %v119_v13, 0.0 }
  0xee   :  { %v135_v18 = vpack.c.bf16 %v133_v15, %v132_v14 }
  0xef   :  { %v134_v19 = vpack.c.bf16 %v131_v17, %v130_v16 }
  0xf1   :  { %638 = vmatprep.mubr.msk.bf16.mxu1 %vm159_vm1, %v134_v19 }
  0xf2   :  { %639 = vmatmul.mubr.msk.bf16.vlgmr.msra.gmra.mrb[0].mxu1 %vm159_vm1, %v135_v18 }
  0xf3   :  { %350 = vmatprep.mubr.bf16.mxu1 %v682_v20 }
 0x1c5   :  { %v640_v22 = vpop.f32.mrb[0].mxu1 }
 0x1c6   :  { %v209_v23 = vadd.f32 %v640_v22, %v606_v21  ;;  %v200_v24 = vpop.f32.mrb[1].mxu1 }
 0x1c7   :  { %v201_v26 = vadd.f32 %v606_v21, %v200_v24  ;;  %v641_v27 = vpop.f32.mrb[2].mxu1 }
 0x1c8   :  { %v212_v28 = vadd.f32 %v641_v27, %v606_v21  ;;  %v203_v29 = vpop.f32.mrb[3].mxu1  ;;  %v222_v31 = vmul.f32 %v219_v25, %v209_v23  ;;  %v299_v55 = vmul.f32 2.0, %v209_v23 }
 0x1c9   :  { %v204_v30 = vadd.f32 %v606_v21, %v203_v29  ;;  %v220_v34 = vmul.f32 %v219_v25, %v201_v26  ;;  %v297_v41 = vmul.f32 2.0, %v201_v26 }
 0x1ca   :  { %v223_v32 = vmul.f32 %v219_v25, %v212_v28  ;;  %v226_v33 = vpack.c.bf16 %v212_v28, %v209_v23  ;;  %v300_v60 = vmul.f32 2.0, %v212_v28 }
 0x1cb   :  { %v221_v35 = vmul.f32 %v219_v25, %v204_v30  ;;  %v224_v36 = vpack.c.bf16 %v204_v30, %v201_v26  ;;  %v298_v46 = vmul.f32 2.0, %v204_v30 }
 0x1cc   :  { %v227_v37 = vpack.c.bf16 %v223_v32, %v222_v31 }
 0x1cd   :  { %v225_v38 = vpack.c.bf16 %v221_v35, %v220_v34 }
 0x1cf   :  { %244 = vmatprep.subr.bf16.mxu0 %v225_v38  ;;  %v453_v38 = vstv %s596_s20 }
 0x1d0   :  { %245 = vmatpush1.bf16.msra.mxu0 %v224_v36 }
 0x1d1   :  { %246 = vmatprep.subr.bf16.mxu0 %v227_v37 }
 0x1d4   :  { %247 = vmatpush1.bf16.msra.mxu0 %v226_v33 }
 0x1d7   :  { %613 = vmatmul.mubr.msk.bf16.vlgmr.msra.gmra.mrb[4].mxu0 %vm159_vm1, %v754_v39 }
 0x1d8   :  { %286 = vmatprep.mubr.bf16.mxu0 %v682_v20 }
 0x1df   :  { %614 = vmatmul.mubr.msk.bf16.gmra.mrb[8].mxu0 %vm159_vm1, %v762_v40 }
 0x1e0   :  { %424 = vmatprep.mubr.bf16.mxu0 %v682_v20 }
 0x2aa   :  { %v278_v42 = vpop.f32.mrb[4].mxu0 }
 0x2ab   :  { %v301_v44 = vsub.f32 %v297_v41, %v278_v42  ;;  %v280_v45 = vpop.f32.mrb[5].mxu0 }
 0x2ac   :  { %v282_v47 = vpop.f32.mrb[6].mxu0 }
 0x2ad   :  { %v306_v48 = vmul.f32 %v305_v43, %v301_v44  ;;  %v302_v49 = vsub.f32 %v298_v46, %v282_v47  ;;  %v284_v50 = vpop.f32.mrb[7].mxu0  ;;  %v371_v6 = vmul.f32 2.0, %v301_v44 }
 0x2af   :  { %v310_v51 = vadd.f32 %v306_v48, %v280_v45  ;;  %v314_v52 = vpack.c.bf16 %v302_v49, %v301_v44  ;;  %v307_v53 = vmul.f32 %v305_v43, %v302_v49  ;;  %v372_v11 = vmul.f32 2.0, %v302_v49 }
 0x2b1   :  { %v311_v54 = vadd.f32 %v307_v53, %v284_v50 }
 0x2b2   :  { %v288_v56 = vpop.f32.mrb[8].mxu0 }
 0x2b3   :  { %v315_v57 = vpack.c.bf16 %v311_v54, %v310_v51  ;;  %v303_v58 = vsub.f32 %v299_v55, %v288_v56  ;;  %v290_v59 = vpop.f32.mrb[9].mxu0 }
 0x2b4   :  { %v292_v61 = vpop.f32.mrb[10].mxu0 }
 0x2b5   :  { %v308_v62 = vmul.f32 %v305_v43, %v303_v58  ;;  %v304_v63 = vsub.f32 %v300_v60, %v292_v61  ;;  %v294_v0 = vpop.f32.mrb[11].mxu0  ;;  %318 = vmatprep.subr.bf16.mxu1 %v315_v57  ;;  %v373_v21 = vmul.f32 2.0, %v303_v58 }
 0x2b6   :  { %319 = vmatpush1.bf16.msra.mxu1 %v314_v52 }
 0x2b7   :  { %v312_v1 = vadd.f32 %v308_v62, %v290_v59  ;;  %v316_v2 = vpack.c.bf16 %v304_v63, %v303_v58  ;;  %v309_v3 = vmul.f32 %v305_v43, %v304_v63  ;;  %v374_v26 = vmul.f32 2.0, %v304_v63 }
 0x2b9   :  { %v313_v4 = vadd.f32 %v309_v3, %v294_v0  ;;  %v536_v3 = vlaneseq }
 0x2bb   :  { %v317_v5 = vpack.c.bf16 %v313_v4, %v312_v1 }
 0x2bd   :  { %320 = vmatprep.subr.bf16.mxu1 %v317_v5 }
 0x2be   :  { %321 = vmatpush1.bf16.msra.mxu1 %v316_v2 }
 0x2c1   :  { %615 = vmatmul.mubr.msk.bf16.vlgmr.msra.gmra.mrb[4].mxu1 %vm159_vm1, %v754_v39 }
 0x2c2   :  { %360 = vmatprep.mubr.bf16.mxu1 %v682_v20 }
 0x2c9   :  { %616 = vmatmul.mubr.msk.bf16.gmra.mrb[8].mxu1 %vm159_vm1, %v762_v40 }
 0x2ca   :  { %498 = vmatprep.mubr.bf16.mxu1 %v682_v20 }
 0x394   :  { %v352_v7 = vpop.f32.mrb[4].mxu1 }
 0x395   :  { %v375_v9 = vsub.f32 %v371_v6, %v352_v7  ;;  %v354_v10 = vpop.f32.mrb[5].mxu1  ;;  %v527_v6 = vstv %s40_s21  ;;  %v537_v7 = vand.u32 127, %v536_v3 }
 0x396   :  { %v356_v12 = vpop.f32.mrb[6].mxu1 }
 0x397   :  { %v380_v13 = vmul.f32 %v379_v8, %v375_v9  ;;  %v376_v14 = vsub.f32 %v372_v11, %v356_v12  ;;  %v358_v15 = vpop.f32.mrb[7].mxu1  ;;  %v445_v36 = vmul.f32 2.0, %v375_v9  ;;  %vm538_vm2 = vcmp.lt.s32.totalorder %v537_v7, 8 }
 0x399   :  { %v384_v16 = vadd.f32 %v380_v13, %v354_v10  ;;  %v388_v17 = vpack.c.bf16 %v376_v14, %v375_v9  ;;  %v381_v18 = vmul.f32 %v379_v8, %v376_v14  ;;  %v446_v43 = vmul.f32 2.0, %v376_v14 }
 0x39b   :  { %v385_v19 = vadd.f32 %v381_v18, %v358_v15 }
 0x39c   :  { %v362_v22 = vpop.f32.mrb[8].mxu1 }
 0x39d   :  { %v389_v23 = vpack.c.bf16 %v385_v19, %v384_v16  ;;  %v377_v24 = vsub.f32 %v373_v21, %v362_v22  ;;  %v364_v25 = vpop.f32.mrb[9].mxu1 }
 0x39e   :  { %v366_v27 = vpop.f32.mrb[10].mxu1 }
 0x39f   :  { %v382_v28 = vmul.f32 %v379_v8, %v377_v24  ;;  %v378_v29 = vsub.f32 %v374_v26, %v366_v27  ;;  %v368_v30 = vpop.f32.mrb[11].mxu1  ;;  %392 = vmatprep.subr.bf16.mxu0 %v389_v23  ;;  %v447_v52 = vmul.f32 2.0, %v377_v24 }
 0x3a0   :  { %393 = vmatpush1.bf16.msra.mxu0 %v388_v17 }
 0x3a1   :  { %v386_v31 = vadd.f32 %v382_v28, %v364_v25  ;;  %v390_v32 = vpack.c.bf16 %v378_v29, %v377_v24  ;;  %v383_v33 = vmul.f32 %v379_v8, %v378_v29  ;;  %v448_v57 = vmul.f32 2.0, %v378_v29 }
 0x3a3   :  { %v387_v34 = vadd.f32 %v383_v33, %v368_v30 }
 0x3a5   :  { %v391_v35 = vpack.c.bf16 %v387_v34, %v386_v31 }
 0x3a7   :  { %394 = vmatprep.subr.bf16.mxu0 %v391_v35 }
 0x3a8   :  { %395 = vmatpush1.bf16.msra.mxu0 %v390_v32 }
 0x3ab   :  { %617 = vmatmul.mubr.msk.bf16.vlgmr.msra.gmra.mrb[12].mxu0 %vm159_vm1, %v754_v39 }
 0x3ac   :  { %434 = vmatprep.mubr.bf16.mxu0 %v682_v20 }
 0x3b3   :  { %618 = vmatmul.mubr.msk.bf16.gmra.mrb[16].mxu0 %vm159_vm1, %v762_v40 }
 0x47e   :  { %v426_v37 = vpop.f32.mrb[12].mxu0 }
 0x47f   :  { %v449_v41 = vsub.f32 %v445_v36, %v426_v37  ;;  %v428_v42 = vpop.f32.mrb[13].mxu0 }
 0x480   :  { %v430_v44 = vpop.f32.mrb[14].mxu0 }
 0x481   :  { %v454_v45 = vmul.f32 %v453_v38, %v449_v41  ;;  %v450_v46 = vsub.f32 %v446_v43, %v430_v44  ;;  %v432_v47 = vpop.f32.mrb[15].mxu0  ;;  %v519_v4 = vmul.f32 2.0, %v449_v41 }
 0x483   :  { %v458_v48 = vadd.f32 %v454_v45, %v428_v42  ;;  %v462_v49 = vpack.c.bf16 %v450_v46, %v449_v41  ;;  %v455_v50 = vmul.f32 %v453_v38, %v450_v46  ;;  %v520_v10 = vmul.f32 2.0, %v450_v46 }
 0x485   :  { %v459_v51 = vadd.f32 %v455_v50, %v432_v47 }
 0x486   :  { %v436_v53 = vpop.f32.mrb[16].mxu0 }
 0x487   :  { %v463_v54 = vpack.c.bf16 %v459_v51, %v458_v48  ;;  %v451_v55 = vsub.f32 %v447_v52, %v436_v53  ;;  %v438_v56 = vpop.f32.mrb[17].mxu0 }
 0x488   :  { %v440_v58 = vpop.f32.mrb[18].mxu0 }
 0x489   :  { %v456_v59 = vmul.f32 %v453_v38, %v451_v55  ;;  %v452_v60 = vsub.f32 %v448_v57, %v440_v58  ;;  %v442_v61 = vpop.f32.mrb[19].mxu0  ;;  %466 = vmatprep.subr.bf16.mxu1 %v463_v54  ;;  %v521_v16 = vmul.f32 2.0, %v451_v55 }
 0x48a   :  { %467 = vmatpush1.bf16.msra.mxu1 %v462_v49 }
 0x48b   :  { %v460_v62 = vadd.f32 %v456_v59, %v438_v56  ;;  %v464_v63 = vpack.c.bf16 %v452_v60, %v451_v55  ;;  %v457_v0 = vmul.f32 %v453_v38, %v452_v60  ;;  %v522_v21 = vmul.f32 2.0, %v452_v60 }
 0x48d   :  { %v461_v1 = vadd.f32 %v457_v0, %v442_v61 }
 0x48f   :  { %v465_v2 = vpack.c.bf16 %v461_v1, %v460_v62 }
 0x491   :  { %468 = vmatprep.subr.bf16.mxu1 %v465_v2 }
 0x492   :  { %469 = vmatpush1.bf16.msra.mxu1 %v464_v63 }
 0x495   :  { %619 = vmatmul.mubr.msk.bf16.vlgmr.msra.gmra.mrb[12].mxu1 %vm159_vm1, %v754_v39 }
 0x496   :  { %508 = vmatprep.mubr.bf16.mxu1 %v682_v20 }
 0x49d   :  { %620 = vmatmul.mubr.msk.bf16.gmra.mrb[16].mxu1 %vm159_vm1, %v762_v40 }
 0x568   :  { %v500_v5 = vpop.f32.mrb[12].mxu1 }
 0x569   :  { %v523_v8 = vsub.f32 %v519_v4, %v500_v5  ;;  %v502_v9 = vpop.f32.mrb[13].mxu1 }
 0x56a   :  { %v504_v11 = vpop.f32.mrb[14].mxu1 }
 0x56b   :  { %v528_v12 = vmul.f32 %v527_v6, %v523_v8  ;;  %v524_v13 = vsub.f32 %v520_v10, %v504_v11  ;;  %v506_v14 = vpop.f32.mrb[15].mxu1 }
 0x56d   :  { %v532_v39 = vadd.f32 %v528_v12, %v502_v9  ;;  %v529_v15 = vmul.f32 %v527_v6, %v524_v13 }
 0x56f   :  { %v533_v20 = vadd.f32 %v529_v15, %v506_v14  ;;  %v539_v40 = vsel %vm538_vm2, %v532_v39, -inf }
 0x570   :  { %v510_v17 = vpop.f32.mrb[16].mxu1  ;;  %543 = vmax.xlane.f32.xlu0 %v539_v40 }
 0x571   :  { %v525_v18 = vsub.f32 %v521_v16, %v510_v17  ;;  %v512_v19 = vpop.f32.mrb[17].mxu1  ;;  %v540_v25 = vsel %vm538_vm2, %v533_v20, -inf }
 0x572   :  { %v514_v22 = vpop.f32.mrb[18].mxu1 }
 0x573   :  { %v530_v23 = vmul.f32 %v527_v6, %v525_v18  ;;  %v526_v24 = vsub.f32 %v522_v21, %v514_v22  ;;  %v516_v26 = vpop.f32.mrb[19].mxu1 }
 0x574   :  { %545 = vmax.xlane.f32.xlu0 %v540_v25 }
 0x575   :  { %v534_v27 = vadd.f32 %v530_v23, %v512_v19  ;;  %v531_v28 = vmul.f32 %v527_v6, %v526_v24 }
 0x577   :  { %v535_v29 = vadd.f32 %v531_v28, %v516_v26  ;;  %v541_v30 = vsel %vm538_vm2, %v534_v27, -inf }
 0x578   :  { %547 = vmax.xlane.f32.xlu1 %v541_v30 }
 0x579   :  { %v542_v31 = vsel %vm538_vm2, %v535_v29, -inf }
 0x57c   :  { %549 = vmax.xlane.f32.xlu1 %v542_v31 }
 0x5fd   :  { %v544_v32 = vpop.xlane.xlu0 %543 }
 0x5fe   :  { %v551_v33 = vsub.f32 %v532_v39, %v544_v32 }
 0x600   :  { %v555_v34 = vmul.f32 1.442695, %v551_v33 }
 0x601   :  { %v546_v35 = vpop.xlane.xlu0 %545 }
 0x602   :  { %651 = vpow2.f32 %v555_v34  ;;  %v552_v36 = vsub.f32 %v533_v20, %v546_v35 }
 0x604   :  { %v557_v37 = vmul.f32 1.442695, %v552_v36 }
 0x605   :  { %v548_v38 = vpop.xlane.xlu1 %547 }
 0x606   :  { %653 = vpow2.f32 %v557_v37  ;;  %v553_v41 = vsub.f32 %v534_v27, %v548_v38 }
 0x608   :  { %v559_v42 = vmul.f32 1.442695, %v553_v41 }
 0x609   :  { %v550_v43 = vpop.xlane.xlu1 %549 }
 0x60a   :  { %655 = vpow2.f32 %v559_v42  ;;  %v554_v44 = vsub.f32 %v535_v29, %v550_v43 }
 0x60c   :  { %v652_v45 = vpop.eup %651  ;;  %v561_v46 = vmul.f32 1.442695, %v554_v44 }
 0x60d   :  { %v563_v47 = vsel %vm538_vm2, %v652_v45, 0.0 }
 0x60e   :  { %657 = vpow2.f32 %v561_v46  ;;  %567 = vadd.xlane.f32.xlu0 %v563_v47 }
 0x610   :  { %v654_v48 = vpop.eup %653 }
 0x611   :  { %v564_v49 = vsel %vm538_vm2, %v654_v48, 0.0 }
 0x612   :  { %569 = vadd.xlane.f32.xlu1 %v564_v49 }
 0x614   :  { %v656_v50 = vpop.eup %655 }
 0x615   :  { %v565_v51 = vsel %vm538_vm2, %v656_v50, 0.0 }
 0x616   :  { %571 = vadd.xlane.f32.xlu0 %v565_v51 }
 0x618   :  { %v658_v52 = vpop.eup %657 }
 0x619   :  { %v566_v53 = vsel %vm538_vm2, %v658_v52, 0.0 }
 0x61a   :  { %573 = vadd.xlane.f32.xlu1 %v566_v53 }
 0x69b   :  { %v568_v54 = vpop.xlane.xlu0 %567 }
 0x69c   :  { %659 = vlog2.f32 %v568_v54 }
 0x69f   :  { %v570_v55 = vpop.xlane.xlu1 %569 }
 0x6a0   :  { %661 = vlog2.f32 %v570_v55 }
 0x6a3   :  { %v572_v56 = vpop.xlane.xlu0 %571 }
 0x6a4   :  { %663 = vlog2.f32 %v572_v56 }
 0x6a6   :  { %v660_v57 = vpop.eup %659 }
 0x6a7   :  { %v576_v58 = vmul.f32 0.6931472, %v660_v57  ;;  %v574_v59 = vpop.xlane.xlu1 %573 }
 0x6a8   :  { %665 = vlog2.f32 %v574_v59 }
 0x6a9   :  { %v583_v60 = vsub.f32 %v551_v33, %v576_v58 }
 0x6aa   :  { %v662_v61 = vpop.eup %661 }
 0x6ab   :  { %587 = vst [vmem:[%s810_s7] sm:$0xff] %v583_v60  ;;  %v578_v62 = vmul.f32 0.6931472, %v662_v61 }
 0x6ad   :  { %v584_v63 = vsub.f32 %v552_v36, %v578_v62 }
 0x6ae   :  { %v664_v0 = vpop.eup %663 }
 0x6af   :  { %588 = vst [vmem:[%s810_s7 + $0x8] sm:$0xff] %v584_v63  ;;  %v580_v1 = vmul.f32 0.6931472, %v664_v0 }
 0x6b1   :  { %v585_v2 = vsub.f32 %v553_v41, %v580_v1 }
 0x6b2   :  { %v666_v3 = vpop.eup %665 }
 0x6b3   :  { %589 = vst [vmem:[%s810_s7 + $0x10] sm:$0xff] %v585_v2  ;;  %v582_v4 = vmul.f32 0.6931472, %v666_v3 }
 0x6b5   :  { %v586_v5 = vsub.f32 %v554_v44, %v582_v4 }
 0x6b7   :  { %590 = vst [vmem:[%s810_s7 + $0x18] sm:$0xff] %v586_v5 }
 0x6b8   :  { %595 = vsyncpa [#allocation3], 1 }

</bundles_post_ra>
